<compile_context>
chip_gen: v5e
topology: v5e:2x2
jax: 0.10.0
libtpu: 0.0.40
codegen_flags: <defaults>
</compile_context>

<pallas_src>
import jax
import jax.numpy as jnp
import numpy as np
from jax import lax
from jax.experimental import pallas as pl
from jax.experimental.pallas import tpu as pltpu

BN_EPS = 1e-5


# --------------------------------------------------------------------------- #
# Kernel
# --------------------------------------------------------------------------- #
def _mixed_op_kernel(a_skip_ref, x_ref, wconv_ref, wpool_ref, bias_ref,
                     invcnt_ref, out_ref, xpad_scr):
    Nt, H, WC = x_ref.shape            # WC = W * C (lane-dense packed layout)

    x = x_ref[...]                     # (Nt, H, WC) f32

    # H-only zero padding in VMEM scratch. W-boundary clipping is encoded in the
    # block-Toeplitz weights, so no lane-strip masking is needed. Border rows are
    # re-zeroed every step (scratch is per-core and uninitialized; a
    # pl.when(program_id==0) guard would miss core 1's first step under megacore).
    zero_row = jnp.zeros((Nt, 1, WC), xpad_scr.dtype)
    xpad_scr[:, 0:1, :] = zero_row
    xpad_scr[:, H + 1:H + 2, :] = zero_row
    xpad_scr[:, 1:H + 1, :] = x
    xpad = xpad_scr[...]               # (Nt, H+2, WC)

    # --- conv3x3 + entangled conv1x1: 3 accumulating block-Toeplitz matmuls ----
    # wconv carries alpha_c3*BN3 scale on all taps plus alpha_c1*BN1 on the
    # center tap; bias carries both folded BN biases. bf16 operands -> native MXU.
    xr = jnp.maximum(xpad, 0.0).astype(wconv_ref.dtype)      # ReLU (pad rows stay 0)
    NtH = Nt * H
    acc = jnp.dot(xr[:, 0:H, :].reshape(NtH, WC), wconv_ref[0],
                  preferred_element_type=jnp.float32)
    acc = acc + jnp.dot(xr[:, 1:H + 1, :].reshape(NtH, WC), wconv_ref[1],
                        preferred_element_type=jnp.float32)
    acc = acc + jnp.dot(xr[:, 2:H + 2, :].reshape(NtH, WC), wconv_ref[2],
                        preferred_element_type=jnp.float32)
    conv = (acc + bias_ref[...]).reshape(Nt, H, WC)

    # --- avg_pool_3x3 (pre-ReLU x, count_include_pad=False) --------------------
    # dh via sublane slices; dw via one banded channel-identity matmul;
    # alpha_pool is folded into invcnt host-side. Kept in f32.
    rs = xpad[:, 0:H, :] + xpad[:, 1:H + 1, :] + xpad[:, 2:H + 2, :]
    pool = jnp.dot(rs.reshape(NtH, WC), wpool_ref[...],
                   preferred_element_type=jnp.float32).reshape(Nt, H, WC)
    pool = pool * invcnt_ref[...]

    # --- skip_connect * alpha_skip (scalar from SMEM); 'none' contributes zero --
    out_ref[...] = (x * a_skip_ref[0] + conv + pool).astype(out_ref.dtype)


# --------------------------------------------------------------------------- #
# Host-side constant folding
# --------------------------------------------------------------------------- #
def _fold_bn(bn):
    gamma, beta, mean, var = bn
    scale = gamma / jnp.sqrt(var + BN_EPS)
    bias = beta - mean * scale
    return scale, bias                                        # (C,), (C,)


def _pool_count_np(H, W):
    h = np.arange(H)
    w = np.arange(W)
    rc = np.minimum(h + 1, H - 1) - np.maximum(h - 1, 0) + 1
    cc = np.minimum(w + 1, W - 1) - np.maximum(w - 1, 0) + 1
    return (rc[:, None] * cc[None, :]).astype(np.float32)     # (H, W)


def _build_weights(w3_oihw, bn3, bn1, alphas, W, C):
    """Fold alphas/BN/entanglement and build block-Toeplitz conv + pool matrices."""
    a_c3, a_c1 = alphas[2], alphas[3]
    bn3s, bn3b = _fold_bn(bn3)
    bn1s, bn1b = _fold_bn(bn1)

    # (dh, dw, ci, co); BN scale * alpha folded into output channels; entangled
    # 1x1 op folded into the center tap (it reuses the shared 3x3 weight).
    w_taps = jnp.transpose(w3_oihw, (2, 3, 1, 0))              # (3, 3, Ci, Co)
    w_eff = w_taps * (a_c3 * bn3s)
    w_eff = w_eff.at[1, 1].add(w_taps[1, 1] * (a_c1 * bn1s))
    bias_c = a_c3 * bn3b + a_c1 * bn1b                         # (Co,)

    # Block-Toeplitz over the W axis, per dh: (W*Ci, W*Co). W-boundary clipping
    # (padding=1) is encoded as structural zeros, so the kernel never needs
    # W-direction zero padding.
    wi = np.arange(W)[:, None]
    wo = np.arange(W)[None, :]
    dw = wi - wo + 1                                           # (W, W)
    valid = jnp.asarray(((dw >= 0) & (dw <= 2)).astype(np.float32))
    dw_c = np.clip(dw, 0, 2)
    taps = w_eff[:, dw_c] * valid[None, :, :, None, None]      # (3, W, W, Ci, Co)
    w_toep = jnp.transpose(taps, (0, 1, 3, 2, 4)).reshape(3, W * C, W * C)

    # Pool band matrix: channel-identity, |w_in - w_out| <= 1 (kept f32).
    band = (np.abs(wi - wo) <= 1).astype(np.float32)
    p_band = np.einsum('ab,cd->acbd', band,
                       np.eye(C, dtype=np.float32)).reshape(W * C, W * C)

    bias_wc = jnp.tile(bias_c, (W,)).reshape(1, W * C)
    return (w_toep.astype(jnp.bfloat16), jnp.asarray(p_band),
            bias_wc.astype(jnp.float32))


# --------------------------------------------------------------------------- #
# VMEM accounting / tile selection
# --------------------------------------------------------------------------- #
def _round_up(v, m):
    return (v + m - 1) // m * m


def _device_caps():
    kind = ""
    try:
        kind = jax.devices()[0].device_kind.lower()
    except Exception:
        pass
    is_v7 = "v7" in kind
    if is_v7:
        cap = 48 << 20          # v7x: 64 MiB physical per TC -> cap at ~48 MiB
    elif ("v6" in kind) or ("v5" in kind):
        cap = 96 << 20          # v5e/v6e: 128 MiB physical -> raise past 16/32 default
    else:
        cap = 48 << 20          # unknown generation: conservative
    return cap, is_v7


def _pick_n_tile(N, H, WC, cap, is_v7):
    """Honest per-n VMEM estimate incl. lane/sublane padding and double buffering."""
    wc_p = _round_up(WC, 128)
    h_p = _round_up(H, 8)
    hp2_p = _round_up(H + 2, 8)
    F32, BF16 = 4, 2
    per_n = (2 * h_p * wc_p * F32        # input tile (double-buffered)
             + 2 * h_p * wc_p * F32      # output tile (double-buffered)
             + hp2_p * wc_p * F32        # xpad scratch
             + hp2_p * wc_p * BF16       # relu/bf16 copy
             + 3 * h_p * wc_p * BF16     # dh-sliced matmul LHS temps
             + 4 * h_p * wc_p * F32)     # conv acc / rs / pool / mix temps
    fixed = 2 * (3 * WC * wc_p * BF16    # conv Toeplitz slabs
                 + WC * wc_p * F32       # pool band matrix
                 + 8 * wc_p * F32        # bias row
                 + h_p * wc_p * F32)     # invcnt
    slack = 4 << 20
    avail = max(cap - fixed - slack, per_n)
    n_tile = int(max(1, min(N, avail // per_n)))
    if is_v7 and N >= 2:
        n_tile = min(n_tile, max(1, N // 2))   # >=2 grid steps -> both v7x cores work
    return n_tile


# --------------------------------------------------------------------------- #
# Wrappers
# --------------------------------------------------------------------------- #
def nb201_mixed_op_nhwc(x_nhwc, alphas, w3_oihw, bn3, bn1, n_tile=None):
    """x_nhwc: (N,H,W,C) f32; alphas: (5,); w3_oihw: (C,C,3,3); bn*: (g,b,mean,var)."""
    N, H, W, C = x_nhwc.shape
    assert w3_oihw.shape == (C, C, 3, 3), "stride-1, C_in == C_out NB201 cell op only"
    WC = W * C

    x = x_nhwc.reshape(N, H, WC).astype(jnp.float32)           # lane-dense packing (free)

    w_toep, w_pool, bias_wc = _build_weights(w3_oihw, bn3, bn1, alphas, W, C)

    inv = np.repeat(1.0 / _pool_count_np(H, W), C, axis=1)     # (H, W*C)
    invcnt = jnp.asarray(inv[None], jnp.float32) * alphas[4]   # alpha_pool folded in
    a_skip = jnp.reshape(alphas[1], (1,)).astype(jnp.float32)  # SMEM scalar
    # alphas[0] ('none') contributes zero.

    cap, is_v7 = _device_caps()
    if n_tile is None:
        n_tile = _pick_n_tile(N, H, WC, cap, is_v7)
    n_tile = int(min(n_tile, N))

    grid = (pl.cdiv(N, n_tile),)                               # ragged last tile is masked

    out = pl.pallas_call(
        _mixed_op_kernel,
        out_shape=jax.ShapeDtypeStruct((N, H, WC), jnp.float32),
        grid_spec=pltpu.PrefetchScalarGridSpec(
            num_scalar_prefetch=0,
            grid=grid,
            in_specs=[
                pl.BlockSpec(memory_space=pltpu.MemorySpace.SMEM),      # alpha_skip scalar
                pl.BlockSpec((n_tile, H, WC), lambda n: (n, 0, 0)),     # input tile
                pl.BlockSpec((3, WC, WC), lambda n: (0, 0, 0)),         # conv Toeplitz (bf16)
                pl.BlockSpec((WC, WC), lambda n: (0, 0)),               # pool band (f32)
                pl.BlockSpec((1, WC), lambda n: (0, 0)),                # fused conv bias
                pl.BlockSpec((1, H, WC), lambda n: (0, 0, 0)),          # invcnt * alpha_pool
            ],
            out_specs=pl.BlockSpec((n_tile, H, WC), lambda n: (n, 0, 0)),
            scratch_shapes=[
                pltpu.VMEM((n_tile, H + 2, WC), jnp.float32),           # H-padded scratch
            ],
        ),
        compiler_params=pltpu.CompilerParams(
            dimension_semantics=("parallel",),
            vmem_limit_bytes=int(cap),
        ),
    )(a_skip, x, w_toep, w_pool, bias_wc, invcnt)

    return out.reshape(N, H, W, C)


def nb201_mixed_op(x_nchw, alphas, w3_oihw, bn3, bn1, n_tile=None):
    """NCHW entry point matching the PyTorch module contract."""
    # TODO(synk): keep the surrounding cell / search phase in NHWC (or the packed
    # (N,H,W*C) layout) so these boundary transposes — pure HBM round trips ~2x
    # the kernel's own I/O — can be deleted; use nb201_mixed_op_nhwc directly.
    x_nhwc = jnp.transpose(x_nchw, (0, 2, 3, 1))
    out_nhwc = nb201_mixed_op_nhwc(x_nhwc, alphas, w3_oihw, bn3, bn1, n_tile)
    return jnp.transpose(out_nhwc, (0, 3, 1, 2))


# --------------------------------------------------------------------------- #
# Pure-JAX reference (eval-mode BN) and self-test
# --------------------------------------------------------------------------- #
def _reference(x_nchw, alphas, w3_oihw, bn3, bn1):
    N, C, H, W = x_nchw.shape
    x = jnp.transpose(x_nchw, (0, 2, 3, 1))
    xr = jax.nn.relu(x)
    w_hwio = jnp.transpose(w3_oihw, (2, 3, 1, 0))

    g3, b3, m3, v3 = bn3
    conv3 = lax.conv_general_dilated(xr, w_hwio, (1, 1), ((1, 1), (1, 1)),
                                     dimension_numbers=('NHWC', 'HWIO', 'NHWC'))
    conv3 = (conv3 - m3) / jnp.sqrt(v3 + BN_EPS) * g3 + b3

    g1, b1, m1, v1 = bn1
    conv1 = lax.conv_general_dilated(xr, w_hwio[1:2, 1:2], (1, 1), ((0, 0), (0, 0)),
                                     dimension_numbers=('NHWC', 'HWIO', 'NHWC'))
    conv1 = (conv1 - m1) / jnp.sqrt(v1 + BN_EPS) * g1 + b1

    xpad = jnp.pad(x, ((0, 0), (1, 1), (1, 1), (0, 0)))
    pool = jnp.zeros_like(x)
    for dh in range(3):
        for dw in range(3):
            pool = pool + xpad[:, dh:dh + H, dw:dw + W, :]
    pool = pool / jnp.asarray(_pool_count_np(H, W)).reshape(1, H, W, 1)

    out = alphas[1] * x + alphas[2] * conv3 + alphas[3] * conv1 + alphas[4] * pool
    return jnp.transpose(out, (0, 3, 1, 2))


if __name__ == "__main__":
    key = jax.random.PRNGKey(0)
    ks = jax.random.split(key, 12)
    N, C, H, W = 2, 4, 16, 16

    x = jax.random.normal(ks[0], (N, C, H, W), jnp.float32)
    w3 = 0.1 * jax.random.normal(ks[1], (C, C, 3, 3), jnp.float32)   # OIHW conv weight

    bn3 = (1.0 + 0.1 * jax.random.normal(ks[2], (C,), jnp.float32),
           0.1 * jax.random.normal(ks[3], (C,), jnp.float32),
           0.1 * jax.random.normal(ks[4], (C,), jnp.float32),
           0.5 + jnp.abs(jax.random.normal(ks[5], (C,), jnp.float32)))
    bn1 = (1.0 + 0.1 * jax.random.normal(ks[6], (C,), jnp.float32),
           0.1 * jax.random.normal(ks[7], (C,), jnp.float32),
           0.1 * jax.random.normal(ks[8], (C,), jnp.float32),
           0.5 + jnp.abs(jax.random.normal(ks[9], (C,), jnp.float32)))

    alphas = jax.nn.softmax(jax.random.normal(ks[10], (5,), jnp.float32))

    # n_tile=1 -> 2-step grid: exercises the pipelined/tiled (and megacore) path.
    out = nb201_mixed_op(x, alphas, w3, bn3, bn1, n_tile=1)
    jax.block_until_ready(out)

    ref = _reference(x, alphas, w3, bn3, bn1)
    # bf16 MXU operands for the conv path -> slightly looser tolerance than f32.
    np.testing.assert_allclose(np.asarray(out), np.asarray(ref), rtol=1e-2, atol=1e-2)
    print("KERNEL_OK")
</pallas_src>

<mosaic_0001>
module attributes {stable_mosaic.version = 11 : i64} {
  func.func @_mixed_op_kernel(%arg0: i32, %arg1: memref<1xf32, #tpu.memory_space<smem>>, %arg2: memref<1x16x64xf32, #tpu.memory_space<vmem>>, %arg3: memref<3x64x64xbf16, #tpu.memory_space<vmem>>, %arg4: memref<64x64xf32, #tpu.memory_space<vmem>>, %arg5: memref<1x64xf32, #tpu.memory_space<vmem>>, %arg6: memref<1x16x64xf32, #tpu.memory_space<vmem>>, %arg7: memref<1x16x64xf32, #tpu.memory_space<vmem>>, %arg8: memref<1x18x64xf32, #tpu.memory_space<vmem>>) attributes {dimension_semantics = [#tpu.dimension_semantics<parallel>], iteration_bounds = array<i64: 2>, scalar_prefetch = 0 : i64, scratch_operands = 1 : i64, tpu.core_type = #tpu.core_type<tc>, window_params = [{transform_indices = @transform_0, window_bounds = array<i64: 1>}, {transform_indices = @transform_1, window_bounds = array<i64: 1, 16, 64>}, {pipeline_mode = #tpu.pipeline_mode<synchronous>, transform_indices = @transform_2, window_bounds = array<i64: 3, 64, 64>}, {pipeline_mode = #tpu.pipeline_mode<synchronous>, transform_indices = @transform_3, window_bounds = array<i64: 64, 64>}, {pipeline_mode = #tpu.pipeline_mode<synchronous>, transform_indices = @transform_4, window_bounds = array<i64: 1, 64>}, {pipeline_mode = #tpu.pipeline_mode<synchronous>, transform_indices = @transform_5, window_bounds = array<i64: 1, 16, 64>}, {transform_indices = @transform_6, window_bounds = array<i64: 1, 16, 64>}]} {
    %c0 = arith.constant 0 : index
    %c0_0 = arith.constant 0 : index
    %c0_1 = arith.constant 0 : index
    %0 = vector.load %arg2[%c0, %c0_0, %c0_1] : memref<1x16x64xf32, #tpu.memory_space<vmem>>, vector<1x16x64xf32>
    %cst = arith.constant 0.000000e+00 : f32
    %1 = vector.broadcast %cst : f32 to vector<1x1x64xf32>
    %c0_2 = arith.constant 0 : index
    %c0_3 = arith.constant 0 : index
    %c0_4 = arith.constant 0 : index
    %2 = vector.load %arg8[%c0_2, %c0_3, %c0_4] : memref<1x18x64xf32, #tpu.memory_space<vmem>>, vector<1x1x64xf32>
    tpu.vector_store %arg8[%c0_2, %c0_3, %c0_4], %1 {strides = array<i32>} : memref<1x18x64xf32, #tpu.memory_space<vmem>>, vector<1x1x64xf32>,
    %c0_5 = arith.constant 0 : index
    %c17 = arith.constant 17 : index
    %c0_6 = arith.constant 0 : index
    %3 = vector.load %arg8[%c0_5, %c17, %c0_6] : memref<1x18x64xf32, #tpu.memory_space<vmem>>, vector<1x1x64xf32>
    tpu.vector_store %arg8[%c0_5, %c17, %c0_6], %1 {strides = array<i32>} : memref<1x18x64xf32, #tpu.memory_space<vmem>>, vector<1x1x64xf32>,
    %c0_7 = arith.constant 0 : index
    %c1 = arith.constant 1 : index
    %c0_8 = arith.constant 0 : index
    %4 = vector.load %arg8[%c0_7, %c1, %c0_8] : memref<1x18x64xf32, #tpu.memory_space<vmem>>, vector<1x16x64xf32>
    tpu.vector_store %arg8[%c0_7, %c1, %c0_8], %0 {strides = array<i32>} : memref<1x18x64xf32, #tpu.memory_space<vmem>>, vector<1x16x64xf32>,
    %c0_9 = arith.constant 0 : index
    %c0_10 = arith.constant 0 : index
    %c0_11 = arith.constant 0 : index
    %5 = vector.load %arg8[%c0_9, %c0_10, %c0_11] : memref<1x18x64xf32, #tpu.memory_space<vmem>>, vector<1x18x64xf32>
    %cst_12 = arith.constant 0.000000e+00 : f32
    %6 = vector.broadcast %cst_12 : f32 to vector<1x18x64xf32>
    %7 = arith.maximumf %5, %6 : vector<1x18x64xf32>
    %8 = arith.truncf %7 : vector<1x18x64xf32> to vector<1x18x64xbf16>
    %9 = vector.extract_strided_slice %8 {offsets = [0, 0, 0], sizes = [1, 16, 64], strides = [1, 1, 1]} : vector<1x18x64xbf16> to vector<1x16x64xbf16>
    %10 = vector.shape_cast %9 : vector<1x16x64xbf16> to vector<16x64xbf16>
    %c0_13 = arith.constant 0 : index
    %c0_14 = arith.constant 0 : index
    %c0_15 = arith.constant 0 : index
    %11 = vector.load %arg3[%c0_13, %c0_14, %c0_15] : memref<3x64x64xbf16, #tpu.memory_space<vmem>>, vector<1x64x64xbf16>
    %12 = vector.shape_cast %11 : vector<1x64x64xbf16> to vector<64x64xbf16>
    %cst_16 = arith.constant dense<0.000000e+00> : vector<16x64xf32>
    %13 = tpu.matmul %10, %12, %cst_16 {dimension_numbers = #tpu.dot_dimension_numbers<[1], [0], [0], [1], [0, 0, 1, 1], [], []>} : vector<16x64xbf16>, vector<64x64xbf16>, vector<16x64xf32> -> vector<16x64xf32>
    %14 = vector.extract_strided_slice %8 {offsets = [0, 1, 0], sizes = [1, 16, 64], strides = [1, 1, 1]} : vector<1x18x64xbf16> to vector<1x16x64xbf16>
    %15 = vector.shape_cast %14 : vector<1x16x64xbf16> to vector<16x64xbf16>
    %c1_17 = arith.constant 1 : index
    %c0_18 = arith.constant 0 : index
    %c0_19 = arith.constant 0 : index
    %16 = vector.load %arg3[%c1_17, %c0_18, %c0_19] : memref<3x64x64xbf16, #tpu.memory_space<vmem>>, vector<1x64x64xbf16>
    %17 = vector.shape_cast %16 : vector<1x64x64xbf16> to vector<64x64xbf16>
    %cst_20 = arith.constant dense<0.000000e+00> : vector<16x64xf32>
    %18 = tpu.matmul %15, %17, %cst_20 {dimension_numbers = #tpu.dot_dimension_numbers<[1], [0], [0], [1], [0, 0, 1, 1], [], []>} : vector<16x64xbf16>, vector<64x64xbf16>, vector<16x64xf32> -> vector<16x64xf32>
    %19 = arith.addf %13, %18 : vector<16x64xf32>
    %20 = vector.extract_strided_slice %8 {offsets = [0, 2, 0], sizes = [1, 16, 64], strides = [1, 1, 1]} : vector<1x18x64xbf16> to vector<1x16x64xbf16>
    %21 = vector.shape_cast %20 : vector<1x16x64xbf16> to vector<16x64xbf16>
    %c2 = arith.constant 2 : index
    %c0_21 = arith.constant 0 : index
    %c0_22 = arith.constant 0 : index
    %22 = vector.load %arg3[%c2, %c0_21, %c0_22] : memref<3x64x64xbf16, #tpu.memory_space<vmem>>, vector<1x64x64xbf16>
    %23 = vector.shape_cast %22 : vector<1x64x64xbf16> to vector<64x64xbf16>
    %cst_23 = arith.constant dense<0.000000e+00> : vector<16x64xf32>
    %24 = tpu.matmul %21, %23, %cst_23 {dimension_numbers = #tpu.dot_dimension_numbers<[1], [0], [0], [1], [0, 0, 1, 1], [], []>} : vector<16x64xbf16>, vector<64x64xbf16>, vector<16x64xf32> -> vector<16x64xf32>
    %25 = arith.addf %19, %24 : vector<16x64xf32>
    %c0_24 = arith.constant 0 : index
    %c0_25 = arith.constant 0 : index
    %26 = vector.load %arg5[%c0_24, %c0_25] : memref<1x64xf32, #tpu.memory_space<vmem>>, vector<1x64xf32>
    %27 = vector.broadcast %26 : vector<1x64xf32> to vector<16x64xf32>
    %28 = arith.addf %25, %27 : vector<16x64xf32>
    %29 = vector.shape_cast %28 : vector<16x64xf32> to vector<1x16x64xf32>
    %30 = vector.extract_strided_slice %5 {offsets = [0, 0, 0], sizes = [1, 16, 64], strides = [1, 1, 1]} : vector<1x18x64xf32> to vector<1x16x64xf32>
    %31 = vector.extract_strided_slice %5 {offsets = [0, 1, 0], sizes = [1, 16, 64], strides = [1, 1, 1]} : vector<1x18x64xf32> to vector<1x16x64xf32>
    %32 = arith.addf %30, %31 : vector<1x16x64xf32>
    %33 = vector.extract_strided_slice %5 {offsets = [0, 2, 0], sizes = [1, 16, 64], strides = [1, 1, 1]} : vector<1x18x64xf32> to vector<1x16x64xf32>
    %34 = arith.addf %32, %33 : vector<1x16x64xf32>
    %35 = vector.shape_cast %34 : vector<1x16x64xf32> to vector<16x64xf32>
    %c0_26 = arith.constant 0 : index
    %c0_27 = arith.constant 0 : index
    %36 = vector.load %arg4[%c0_26, %c0_27] : memref<64x64xf32, #tpu.memory_space<vmem>>, vector<64x64xf32>
    %cst_28 = arith.constant dense<0.000000e+00> : vector<16x64xf32>
    %37 = tpu.matmul %35, %36, %cst_28 {dimension_numbers = #tpu.dot_dimension_numbers<[1], [0], [0], [1], [0, 0, 1, 1], [], []>} : vector<16x64xf32>, vector<64x64xf32>, vector<16x64xf32> -> vector<16x64xf32>
    %38 = vector.shape_cast %37 : vector<16x64xf32> to vector<1x16x64xf32>
    %c0_29 = arith.constant 0 : index
    %c0_30 = arith.constant 0 : index
    %c0_31 = arith.constant 0 : index
    %39 = vector.load %arg6[%c0_29, %c0_30, %c0_31] : memref<1x16x64xf32, #tpu.memory_space<vmem>>, vector<1x16x64xf32>
    %40 = arith.mulf %38, %39 : vector<1x16x64xf32>
    %c0_32 = arith.constant 0 : index
    %41 = memref.load %arg1[%c0_32] : memref<1xf32, #tpu.memory_space<smem>>
    %42 = vector.broadcast %41 : f32 to vector<1x16x64xf32>
    %43 = arith.mulf %0, %42 : vector<1x16x64xf32>
    %44 = arith.addf %43, %29 : vector<1x16x64xf32>
    %45 = arith.addf %44, %40 : vector<1x16x64xf32>
    %c0_33 = arith.constant 0 : index
    %c0_34 = arith.constant 0 : index
    %c0_35 = arith.constant 0 : index
    %46 = vector.load %arg7[%c0_33, %c0_34, %c0_35] : memref<1x16x64xf32, #tpu.memory_space<vmem>>, vector<1x16x64xf32>
    tpu.vector_store %arg7[%c0_33, %c0_34, %c0_35], %45 {strides = array<i32>} : memref<1x16x64xf32, #tpu.memory_space<vmem>>, vector<1x16x64xf32>,
    return
  }
  func.func @transform_0(%arg0: i32) -> i32 {
    %c0_i32 = arith.constant 0 : i32
    %c0_i32_0 = arith.constant 0 : i32
    return %c0_i32 : i32
  }
  func.func @transform_1(%arg0: i32) -> (i32, i32, i32) {
    %c0_i32 = arith.constant 0 : i32
    %c0_i32_0 = arith.constant 0 : i32
    %c0_i32_1 = arith.constant 0 : i32
    return %arg0, %c0_i32, %c0_i32_0 : i32, i32, i32
  }
  func.func @transform_2(%arg0: i32) -> (i32, i32, i32) {
    %c0_i32 = arith.constant 0 : i32
    %c0_i32_0 = arith.constant 0 : i32
    %c0_i32_1 = arith.constant 0 : i32
    %c0_i32_2 = arith.constant 0 : i32
    return %c0_i32, %c0_i32_0, %c0_i32_1 : i32, i32, i32
  }
  func.func @transform_3(%arg0: i32) -> (i32, i32) {
    %c0_i32 = arith.constant 0 : i32
    %c0_i32_0 = arith.constant 0 : i32
    %c0_i32_1 = arith.constant 0 : i32
    return %c0_i32, %c0_i32_0 : i32, i32
  }
  func.func @transform_4(%arg0: i32) -> (i32, i32) {
    %c0_i32 = arith.constant 0 : i32
    %c0_i32_0 = arith.constant 0 : i32
    %c0_i32_1 = arith.constant 0 : i32
    return %c0_i32, %c0_i32_0 : i32, i32
  }
  func.func @transform_5(%arg0: i32) -> (i32, i32, i32) {
    %c0_i32 = arith.constant 0 : i32
    %c0_i32_0 = arith.constant 0 : i32
    %c0_i32_1 = arith.constant 0 : i32
    %c0_i32_2 = arith.constant 0 : i32
    return %c0_i32, %c0_i32_0, %c0_i32_1 : i32, i32, i32
  }
  func.func @transform_6(%arg0: i32) -> (i32, i32, i32) {
    %c0_i32 = arith.constant 0 : i32
    %c0_i32_0 = arith.constant 0 : i32
    %c0_i32_1 = arith.constant 0 : i32
    return %arg0, %c0_i32, %c0_i32_0 : i32, i32, i32
  }
}

</mosaic_0001>

<bundles_post_ra>
// kernel: tpu_custom_call.1
= control target key start
LH: loop header
LB: loop body
LE: loop exit
PB: predicated region body
PF: predicated region fallthrough
CT: control target
= control target key end

     0   :  { %s1326_s0 = inlined_call_operand.<no memory space> [shape: f32[1], index: 0, kind: input, shape index: {}]   ;;  %s1327_s1 = inlined_call_operand.hbm [shape: f32[2,16,64], index: 1, kind: input, shape index: {}]   ;;  %s1328_s2 = inlined_call_operand.hbm [shape: bf16[3,64,64], index: 2, kind: input, shape index: {}]   ;;  %s1329_s3 = inlined_call_operand.hbm [shape: f32[64,64], index: 3, kind: input, shape index: {}]   ;;  %s1330_s4 = inlined_call_operand.vmem [shape: f32[1,64], index: 4, kind: input, shape index: {}]   ;;  %s1331_s5 = inlined_call_operand.hbm [shape: f32[1,16,64], index: 5, kind: input, shape index: {}]   ;;  %s1332_s6 = inlined_call_operand.hbm [shape: f32[2,16,64], index: 6, kind: output, shape index: {}]  }
   0x1   :  { %11 = sst [smem:[#allocation3]] %s1326_s0 }
   0x2   :  { %12 = vsyncpa [#allocation5], 0 }
   0x3   :  { %14 = vsyncpa [#allocation5 + $0x1], 0 }
   0x4   :  { %15 = vsyncpa [#allocation8], 0 }
   0x5   :  { %16 = vsyncpa [#allocation11], 0 }
   0x6   :  { %17 = vsyncpa [#allocation6], 0 }
   0x7   :  { %19 = vsyncpa [#allocation6 + $0x1], 0  ;;  %s1130_s23 = smov 0   ;;  %s1132_s24 = smov 0  }
   0x8   :  { %s1134_s25 = smov 0   ;;  %s1136_s26 = smov 0  }
   0x9 LB: > { %s1151_s0 = sadd.s32 4294967295, %s1080_s26   ;;  %s714_s27 = sadd.s32 4294967294, %s1080_s26   ;;  %s1080_s26 = sphi %s1136_s26, %s1345_s26   ;;  %s1076_s25 = sphi %s1134_s25, %s1344_s25   ;;  %s1072_s24 = sphi %s1132_s24, %s1343_s24   ;;  %s1068_s23 = sphi %s1130_s23, %s1342_s23  }
   0xa   : > { %p66_p0 = scmp.ne.s32.totalorder %s1072_s24, %s1068_s23  ;;  %p67_p1 = scmp.eq.s32.totalorder %s1151_s0, 0 }
   0xb   : > { %p174_p2 = scmp.eq.s32.totalorder %s1151_s0, 1  ;;  %p180_p3 = scmp.eq.s32.totalorder %s714_s27, 1 }
   0xc   : > { %p1160_p4 = por %p67_p1, %p66_p0  ;;  %p715_p5 = scmp.ge.s32.totalorder %s1080_s26, 1 }
   0xd   : > { %p1165_p6 = por %p180_p3, %p66_p0  ;;  %p187_p7 = scmp.lt.s32.totalorder %s1080_s26, 3 }
   0xe   : > { %s201_s8 = sshll.u32 %s1328_s2, 4  ;;  %s1082_s10 = smov [#allocation7]   ;;  %s202_s8 = int_to_ptr.hbm [resolvable:$true] %s201_s8 }
   0xf   : > { %p1173_p8 = pnand %p715_p5, %p187_p7  ;;  %s203_s11 = sshll.u32 %s1082_s10, 4  ;;  %s204_s11 = int_to_ptr.vmem [resolvable:$true] %s203_s11 }
  0x10   : > { %s215_s15 = sshll.u32 %s1329_s3, 4  ;;  %s1083_s16 = smov 64   ;;  %s216_s15 = int_to_ptr.hbm [resolvable:$true] %s215_s15 }
  0x11   : > { %p817_p9 = pneg %p1173_p8  ;;  %s1084_s17 = smov 4  }
  0x12   : > { %s1085_s18 = smov [#allocation9]   ;;  %s1333_s20 = smov 128  }
  0x13   : > { %p1181_p10 = pnand %p817_p9, %p67_p1  ;;  %s217_s19 = sshll.u32 %s1085_s18, 4  ;;  %s218_s19 = int_to_ptr.vmem [resolvable:$true] %s217_s19 }
  0x14   : > { %s1087_s21 = smov 8   ;;  %s232_s30 = sshll.u32 %s1331_s5, 4  ;;  %s233_s30 = int_to_ptr.hbm [resolvable:$true] %s232_s30 }
  0x15   : > { %820 = dma.hbm_to_vmem [thread:$0]  (!%p1181_p10), %s202_s8, 1536, %s204_s11, [#allocation8], %s1083_s16, %s1083_s16, %s1084_s17  }
  0x16   : > { %823 = dma.hbm_to_vmem [thread:$0]  (!%p1181_p10), %s216_s15, 1024, %s218_s19, [#allocation8], %s1333_s20, %s1333_s20, %s1087_s21  }
  0x17   : > { %s1088_s7 = smov [#allocation10]   ;;  %s1205_s10 = sadd.s32 1, %s1080_s26  }
  0x18   : > { %s234_s8 = sshll.u32 %s1088_s7, 4  ;;  %s50_s11 = ssub.s32 %s1080_s26, %s1205_s10  ;;  %s235_s8 = int_to_ptr.vmem [resolvable:$true] %s234_s8 }
  0x19   : > { %826 = dma.hbm_to_vmem [thread:$0]  (!%p1181_p10), %s233_s30, 256, %s235_s8, [#allocation11], %s1333_s20, %s1333_s20, %s1087_s21  }
  0x1a   : > { %s53_s13 = sadd.s32 1, %s1076_s25  ;;  %p51_p12 = scmp.eq.s32.totalorder %s50_s11, 0 }
  0x1b   : > { %p60_p13 = scmp.ne.s32.totalorder %s1076_s25, %s1072_s24  ;;  %p61_p0 = scmp.eq.s32.totalorder %s1080_s26, 0 }
  0x1c   : > { %s1214_s14 = scalar_select %p51_p12, %s1076_s25, %s53_s13  }
  0x1d   : > { %p1218_p3 = por %p174_p2, %p60_p13  ;;  %p838_p5 = scmp.lt.s32.totalorder %s1080_s26, 2 }
  0x1e   : > { %s248_s12 = sand.u32 1, %s1076_s25   ;;  %s787_s16 = sshll.u32 %s1080_s26, 4 }
  0x1f   : > { %p62_p7 = por %p61_p0, %p60_p13  ;;  %s720_s17 = sshll.u32 %s248_s12, 4 }
  0x20   : > { %s257_s22 = scalar_lea.hbm %s1327_s1, %s787_s16  ;;  %s252_s30 = scalar_lea.vmem [#allocation4], %s720_s17 }
  0x21   : > { %s258_s27 = sshll.u32 %s257_s22, 4  ;;  %s260_s7 = sshll.u32 %s252_s30, 4  ;;  %s259_s27 = int_to_ptr.hbm [resolvable:$true] %s258_s27  ;;  %s261_s7 = int_to_ptr.vmem [resolvable:$true] %s260_s7 }
  0x22   : > { %p1228_p9 = pnand %p838_p5, %p62_p7  ;;  %s249_s11 = scalar_lea.sflag [#allocation5], %s248_s12 }
  0x23   : > { %s976_s13 = sshra.s32 %s259_s27, 4  ;;  %s983_s17 = scalar_lea.hbm %s1327_s1, 32  ;;  %s977_s13 = int_to_ptr.hbm [resolvable:$true] %s976_s13 }
  0x24   : > { %s978_s20 = scalar_lea.hbm %s977_s13, 16  ;;  %p980_p10 = pneg %p1228_p9 }
  0x25   : > { %p979_p2 = scmp.ne.s32.totalorder %s977_s13, %s978_s20  ;;  %p984_p0 = scmp.lt.s32.totalorder %s977_s13, %s1327_s1 }
  0x26   : > { %p985_p5 = scmp.lt.s32.totalorder %s983_s17, %s978_s20 }
  0x27   : > { %p981_p12 = pnand %p980_p10, %p979_p2 }
  0x28   : > { %p986_p7 = por %p985_p5, %p984_p0 }
  0x29   : > { %p982_p13 = pneg %p981_p12 }
  0x2b   : > { %p987_p11 = pnand %p986_p7, %p982_p13 }
  0x2d   : > { %990 = shalt.err (!%p987_p11)
}
  0x2e   : > { %s1340_s12 = smov 128   ;;  %272 = sbr.rel (%p1173_p8) target bundleno = 233 (0xe9), region = 44 }
  0x2f   : > { %830 = dma.hbm_to_vmem [thread:$0]  (!%p1228_p9), %s259_s27, 256, %s261_s7, %s249_s11, %s1340_s12, %s1340_s12, %s1087_s21  }
  0x30   : > { %s1248_s30 = sand.u32 (!%p1173_p8), 1, %s1072_s24  }
  0x31   : > { %s724_s20 = sshll.u32 (!%p1173_p8), %s1248_s30, 4  ;;  %s275_s13 = scalar_lea.sflag (!%p1173_p8), [#allocation5], %s1248_s30 }
  0x32   : > { %s278_s16 = scalar_lea.vmem (!%p1173_p8), [#allocation4], %s724_s20 }
  0x33   : > { %1051 = dma.done.wait (%p1160_p4), %s275_s13, 256  }
  0x34   : > { %1053 = vsyncadd (%p1160_p4), %s275_s13, 4294967040 }
  0x35   : > { %1055 = dma.done.wait (%p67_p1), [#allocation8], 2560  }
  0x36   : > { %1057 = vsyncadd (%p67_p1), [#allocation8], 4294964736 }
  0x37   : > { %1059 = dma.done.wait (%p67_p1), [#allocation11], 256  }
  0x38   : > { %1061 = vsyncadd (%p67_p1), [#allocation11], 4294967040  ;;  %vm326_vm0 = vcmask 516096   ;;  %v1089_v0 = vmov 0.0   ;;  %v791_v1 = vld [vmem:[#allocation7 + $0x18] sm:$0xff]  ;;  %v790_v5 = vld [vmem:[#allocation7 + $0x10] sm:$0xff] }
  0x39   : > { %327 = vst.msk [vmem:[#allocation2] sm:$0x1] %vm326_vm0, %v1089_v0  ;;  %v799_v2 = vld [vmem:[#allocation7 + $0x58] sm:$0xff]  ;;  %450 = vmatpush.bf16.msra.mxu1 %v791_v1  ;;  %v798_v6 = vld [vmem:[#allocation7 + $0x50] sm:$0xff]  ;;  %vm329_vm1 = vcmask 523264   ;;  %v550_v9 = vld [vmem:[#allocation9 + $0x28] sm:$0xff] }
  0x3a   : > { %328 = vst.msk [vmem:[#allocation2 + $0x11] sm:$0x1] %vm326_vm0, %v1089_v0  ;;  %v795_v3 = vld [vmem:[#allocation7 + $0x38] sm:$0xff]  ;;  %504 = vmatpush.bf16.msra.mxu2 %v799_v2  ;;  %v551_v7 = vld [vmem:[#allocation9 + $0x30] sm:$0xff]  ;;  %v789_v12 = vld [vmem:[#allocation7 + $0x8] sm:$0xff]  ;;  %vm469_vm2 = vcmask 1046528  }
  0x3b   : > { %v552_v4 = vld [vmem:[#allocation9 + $0x38] sm:$0xff]  ;;  %410 = vmatpush.bf16.msra.mxu0 %v795_v3  ;;  %v794_v8 = vld [vmem:[#allocation7 + $0x30] sm:$0xff]  ;;  %v797_v13 = vld [vmem:[#allocation7 + $0x48] sm:$0xff]  ;;  %vm535_vm3 = vcmask 1045504   ;;  %vm366_vm4 = vsmask.f32 7424 }
  0x3c   : > { %567 = vmatpush.msra.mxu3 %v552_v4  ;;  %v1266_v10 = vld [vmem:[%s278_s16] sm:$0xff]  ;;  %v1268_v11 = vld [vmem:[%s278_s16 + $0x8] sm:$0xff]  ;;  %s586_s28 = sld [smem:[#allocation3]]  ;;  %s800_s27 = sshll.u32 %s1151_s0, 4 }
  0x3d   : > { %451 = vmatpush.bf16.msra.mxu1 %v790_v5  ;;  %v549_v14 = vld [vmem:[#allocation9 + $0x20] sm:$0xff]  ;;  %330 = vst.msk [vmem:[#allocation2 + $0x1] sm:$0xff] %vm329_vm1, %v1266_v10  ;;  %v793_v15 = vld [vmem:[#allocation7 + $0x28] sm:$0xff]  ;;  %v548_v16 = vld [vmem:[#allocation9 + $0x18] sm:$0xff]  ;;  %s608_s11 = scalar_lea.hbm %s1332_s6, %s800_s27  ;;  %s322_s18 = scalar_lea.vmem [#allocation12], %s724_s20 }
  0x3e   : > { %568 = vmatpush.msra.mxu3 %v551_v7  ;;  %505 = vmatpush.bf16.msra.mxu2 %v798_v6  ;;  %331 = vst.msk [vmem:[#allocation2 + $0x9] sm:$0xff] %vm329_vm1, %v1268_v11  ;;  %v788_v17 = vld [vmem:[#allocation7] sm:$0xff]  ;;  %v547_v19 = vld [vmem:[#allocation9 + $0x10] sm:$0xff]  ;;  %v546_v21 = vld [vmem:[#allocation9 + $0x8] sm:$0xff]  ;;  %s609_s0 = sshll.u32 %s322_s18, 4  ;;  %s611_s17 = sshll.u32 %s608_s11, 4  ;;  %s610_s0 = int_to_ptr.vmem [resolvable:$true] %s609_s0  ;;  %s612_s17 = int_to_ptr.hbm [resolvable:$true] %s611_s17 }
  0x3f   : > { %411 = vmatpush.bf16.msra.mxu0 %v794_v8  ;;  %v796_v18 = vld [vmem:[#allocation7 + $0x40] sm:$0xff]  ;;  %v885_v2 = vld [vmem:[%s1330_s4] ss:$0 sm:$0xff]  ;;  %s597_s19 = scalar_lea.sflag [#allocation6], %s1248_s30  ;;  %s1020_s22 = sshra.s32 %s612_s17, 4  ;;  %s1021_s22 = int_to_ptr.hbm [resolvable:$true] %s1020_s22 }
  0x40   : > { %569 = vmatpush.msra.mxu3 %v550_v9  ;;  %v792_v20 = vld [vmem:[#allocation7 + $0x20] sm:$0xff]  ;;  %s1022_s12 = scalar_lea.hbm %s1021_s22, 16  ;;  %s1026_s16 = scalar_lea.hbm %s1332_s6, 32 }
  0x41   : > { %452 = vmatpush.bf16.msra.mxu1 %v789_v12  ;;  %v545_v23 = vld [vmem:[#allocation9] sm:$0xff]  ;;  %p1023_p1 = scmp.ne.s32.totalorder %s1021_s22, %s1022_s12  ;;  %p1027_p11 = scmp.lt.s32.totalorder %s1021_s22, %s1332_s6 }
  0x42   : > { %570 = vmatpush.msra.mxu3 %v549_v14  ;;  %506 = vmatpush.bf16.msra.mxu2 %v797_v13  ;;  %v587_v0 = vstv %s586_s28  ;;  %v582_v4 = vld [vmem:[#allocation10] sm:$0xff]  ;;  %p1028_p9 = scmp.lt.s32.totalorder %s1026_s16, %s1022_s12 }
  0x43   : > { %412 = vmatpush.bf16.msra.mxu0 %v793_v15  ;;  %v588_v6 = vmul.f32 %v587_v0, %v1266_v10  ;;  %p1024_p4 = pnand %p1023_p1, %p1218_p3 }
  0x44   : > { %571 = vmatpush.msra.mxu3 %v548_v16  ;;  %v332_v22 = vld [vmem:[#allocation2] sm:$0xff]  ;;  %p1029_p2 = por %p1028_p9, %p1027_p11 }
  0x45   : > { %453 = vmatpush.bf16.msra.mxu1 %v788_v17  ;;  %v333_v24 = vld [vmem:[#allocation2 + $0x8] sm:$0xff]  ;;  %v335_v25 = vmax.f32 %v332_v22, 0.0  ;;  %v334_v26 = vld [vmem:[#allocation2 + $0x10] sm:$0x3]  ;;  %v526_v27 = vrot.slane %v332_v22, 1  ;;  %v536_v28 = vrot.slane %v332_v22, 2  ;;  %p1025_p8 = pneg %p1024_p4 }
  0x46   : > { %572 = vmatpush.msra.mxu3 %v547_v19  ;;  %507 = vmatpush.bf16.msra.mxu2 %v796_v18  ;;  %v336_v29 = vmax.f32 %v333_v24, 0.0  ;;  %v337_v30 = vmax.f32 %v334_v26, 0.0  ;;  %v527_v31 = vrot.slane %v333_v24, 1  ;;  %v529_v32 = vrot.slane %v334_v26, 1  ;;  %v583_v18 = vld [vmem:[#allocation10 + $0x8] sm:$0xff] }
  0x47   : > { %413 = vmatpush.bf16.msra.mxu0 %v792_v20  ;;  %v338_v33 = vpack.c.bf16 %v335_v25, %v335_v25  ;;  %v537_v34 = vrot.slane %v333_v24, 2  ;;  %v539_v41 = vrot.slane %v334_v26, 2  ;;  %v589_v19 = vmul.f32 %v587_v0, %v1268_v11  ;;  %p1030_p10 = pnand %p1029_p2, %p1025_p8 }
  0x48   : > { %573 = vmatpush.msra.mxu3 %v546_v21  ;;  %v339_v35 = vpack.c.bf16 %v336_v29, %v336_v29  ;;  %v340_v36 = vpack.c.bf16 %v337_v30, %v337_v30  ;;  %v528_v37 = vsel %vm469_vm2, %v526_v27, %v527_v31  ;;  %v530_v44 = vsel %vm469_vm2, %v527_v31, %v529_v32 }
  0x49   : > { %v361_v38 = vunpack.c.l.b16 %v338_v33  ;;  %v533_v39 = vadd.f32 %v528_v37, %v332_v22  ;;  %v538_v40 = vsel %vm535_vm3, %v536_v28, %v537_v34  ;;  %v534_v48 = vadd.f32 %v530_v44, %v333_v24 }
  0x4a   : > { %574 = vmatpush.msra.mxu3 %v545_v23  ;;  %v362_v42 = vunpack.c.l.b16 %v339_v35  ;;  %v363_v43 = vunpack.c.l.b16 %v340_v36  ;;  %v540_v49 = vsel %vm535_vm3, %v537_v34, %v539_v41 }
  0x4b   : > { %v543_v45 = vadd.f32 %v538_v40, %v533_v39  ;;  %v544_v58 = vadd.f32 %v540_v49, %v534_v48 }
  0x4c   : > { %v364_v46 = vpack.c.b16 %v362_v42, %v361_v38  ;;  %v365_v47 = vpack.c.b16 %v363_v43, %v363_v43 }
  0x4d   : > { %780 = vmatmul.msk.f32.vlgmr.msra.gmra.mxu3 %vm329_vm1, %v543_v45 }
  0x4e   : > { %762 = vmatmul.msk.bf16.vlgmr.msra.gmra.mxu1 %vm329_vm1, %v364_v46  ;;  %v470_v50 = vrot.slane %v364_v46, 1  ;;  %v471_v51 = vrot.slane %v365_v47, 1  ;;  %v368_v52 = vshrl.u32 %v364_v46, 16  ;;  %v370_v53 = vshll.u32 %v364_v46, 16 }
  0x4f   : > { %v375_v54 = vshll.u32 %v365_v47, 16 }
  0x50   : > { %v472_v55 = vsel %vm469_vm2, %v470_v50, %v471_v51  ;;  %v372_v56 = vrot.slane %v370_v53, 1 }
  0x51   : > { %779 = vmatmul.msk.bf16.vlgmr.msra.gmra.mxu2 %vm329_vm1, %v472_v55  ;;  %v377_v57 = vrot.slane %v375_v54, 1 }
  0x52   : > { %v373_v59 = vor.u32 %v372_v56, %v368_v52 }
  0x54   : > { %v378_v60 = vsel %vm366_vm4, %v373_v59, %v377_v57 }
  0x55   : > { %745 = vmatmul.msk.bf16.vlgmr.msra.gmra.mxu0 %vm329_vm1, %v378_v60  ;;  %781 = vmatmul.msk.f32.gmra.mxu3 %vm329_vm1, %v544_v58 }
  0xcb   : > { %v455_v61 = vpop.f32.mrf.mxu1 }
  0xd0   : > { %v576_v63 = vpop.f32.mrf.mxu3 }
  0xd1   : > { %v584_v8 = vmul.f32 %v582_v4, %v576_v63 }
  0xd2   : > { %v415_v62 = vpop.f32.mrf.mxu0 }
  0xd3   : > { %v456_v1 = vadd.f32 %v455_v61, %v415_v62  ;;  %v457_v12 = vpop.f32.mrf.mxu1 }
  0xd4   : > { %v509_v3 = vpop.f32.mrf.mxu2 }
  0xd5   : > { %v514_v5 = vadd.f32 %v509_v3, %v456_v1 }
  0xd7   : > { %v520_v7 = vadd.f32 %v885_v2, %v514_v5 }
  0xd8   : > { %v579_v17 = vpop.f32.mrf.mxu3 }
  0xd9   : > { %v590_v9 = vadd.f32 %v588_v6, %v520_v7  ;;  %v585_v21 = vmul.f32 %v583_v18, %v579_v17 }
  0xda   : > { %v417_v13 = vpop.f32.mrf.mxu0 }
  0xdb   : > { %v592_v14 = vadd.f32 %v590_v9, %v584_v8  ;;  %v458_v15 = vadd.f32 %v457_v12, %v417_v13 }
  0xdc   : > { %v511_v16 = vpop.f32.mrf.mxu2 }
  0xdd   : > { %594 = vst.msk [vmem:[%s322_s18] sm:$0xff] %vm329_vm1, %v592_v14  ;;  %v515_v10 = vadd.f32 %v511_v16, %v458_v15 }
  0xdf   : > { %v521_v20 = vadd.f32 %v885_v2, %v515_v10 }
  0xe1   : > { %v591_v22 = vadd.f32 %v589_v19, %v521_v20 }
  0xe3   : > { %v593_v23 = vadd.f32 %v591_v22, %v585_v21 }
  0xe5   : > { %595 = vst.msk [vmem:[%s322_s18 + $0x8] sm:$0xff] %vm329_vm1, %v593_v23 }
  0xe6   : > { %1033 = shalt.err (!%p1030_p10)
}
  0xe7   : > { %s1090_s30 = smov 128   ;;  %s1091_s21 = smov 8  }
  0xe8   : > { %815 = dma.vmem_to_hbm [thread:$0]  (%p1218_p3), %s610_s0, 256, %s612_s17, %s597_s19, %s1090_s30, %s1090_s30, %s1091_s21  }
  0xe9 PF: > { %s626_s27 = sand.u32 1, %s1068_s23   ;;  %p1341_p12 = scmp.ge.s32.totalorder %s1080_s26, 2 }
  0xea   : > { %s627_s7 = scalar_lea.sflag [#allocation6], %s626_s27 }
  0xeb   : > { %p832_p13 = pnand %p1341_p12, %p1165_p6 }
  0xed   : > { %p833_p0 = pneg %p832_p13 }
  0xef   : > { %1063 = dma.done.wait (%p833_p0), %s627_s7, 256  }
  0xf0   : > { %1065 = vsyncadd (%p833_p0), %s627_s7, 4294967040  ;;  %p22_p5 = scmp.ge.s32.totalorder %s1205_s10, 4   ;;  %s1342_s23 = smov %s1072_s24 }
  0xf1   : > { %s1343_s24 = smov %s1076_s25  ;;  %s1344_s25 = smov %s1214_s14 }
  0xf2   : > { %s1345_s26 = smov %s1205_s10  ;;  %24 = sbr.rel (!%p22_p5) target bundleno = 9 (0x9), region = 103 }
  0xf7   :  { %633 = vsyncpa [#allocation5], 1 }
  0xf8   :  { %635 = vsyncpa [#allocation5 + $0x1], 1 }
  0xf9   :  { %636 = vsyncpa [#allocation8], 1 }
  0xfa   :  { %637 = vsyncpa [#allocation11], 1 }
  0xfb   :  { %638 = vsyncpa [#allocation6], 1 }
  0xfc   :  { %640 = vsyncpa [#allocation6 + $0x1], 1 }

</bundles_post_ra>
